<compile_context>
chip_gen: v7x
topology: tpu7x:2x2x1
jax: 0.10.0
libtpu: 0.0.40
codegen_flags: <defaults>
</compile_context>

<pallas_src>
import jax
import jax.numpy as jnp
from jax.experimental import pallas as pl
from jax.experimental.pallas import tpu as pltpu


# ---------------------------------------------------------------------------
# Kernels
# ---------------------------------------------------------------------------

def value_kernel_small(x_ref, w1_ref, w2_ref, bias_ref, bv_ref, v_ref):
    """Whole-batch, single grid point. Output is (B, 1) (lane-sparse is fine
    at small B)."""
    # fc1 + relu: bf16 operands on the MXU, f32 accumulation, f32 epilogue.
    x = x_ref[...].astype(jnp.bfloat16)
    h1 = jnp.dot(x, w1_ref[...], preferred_element_type=jnp.float32)
    h1 = jnp.maximum(h1 + bias_ref[0:1, :], 0.0)

    # fc2 + relu
    h2 = jnp.dot(h1.astype(jnp.bfloat16), w2_ref[...],
                 preferred_element_type=jnp.float32)
    h2 = jnp.maximum(h2 + bias_ref[1:2, :], 0.0)

    # v head (out_features = 1): VPU multiply + XLU cross-lane reduce; scalar
    # bias read from SMEM.
    v = jnp.sum(h2 * bias_ref[2:3, :], axis=-1, keepdims=True)
    v_ref[...] = v + bv_ref[0]


def value_kernel_batched(x_ref, w1_ref, w2_ref, bias_ref, bv_ref, v_ref):
    """One batch tile per grid step; weights stay VMEM-resident (their
    index_maps return block (0,0) every step). Output block is a lane-dense
    1-D (TB,) slab."""
    x = x_ref[...].astype(jnp.bfloat16)
    h1 = jnp.dot(x, w1_ref[...], preferred_element_type=jnp.float32)
    h1 = jnp.maximum(h1 + bias_ref[0:1, :], 0.0)

    h2 = jnp.dot(h1.astype(jnp.bfloat16), w2_ref[...],
                 preferred_element_type=jnp.float32)
    h2 = jnp.maximum(h2 + bias_ref[1:2, :], 0.0)

    v = jnp.sum(h2 * bias_ref[2:3, :], axis=-1)      # (TB,)
    v_ref[...] = v + bv_ref[0]                       # unmasked lane-dense store


# ---------------------------------------------------------------------------
# Wrapper
# ---------------------------------------------------------------------------

def value_forward(state, params, *, batch_tile=512):
    """Pallas implementation of ValueNetwork.forward(state) -> (B, 1)."""
    w1, w2, bias_pack, bv = params
    B, D = state.shape
    H1 = w1.shape[1]
    H2 = w2.shape[1]

    # Advisory cost for XLA's scheduler (tiny custom call inside a SAC step).
    flops = 2 * B * (D * H1 + H1 * H2 + H2)
    param_bytes = (w1.size * w1.dtype.itemsize + w2.size * w2.dtype.itemsize
                   + bias_pack.size * bias_pack.dtype.itemsize
                   + bv.size * bv.dtype.itemsize)
    io_bytes = B * D * state.dtype.itemsize + B * 4
    cost = pl.CostEstimate(flops=flops, transcendentals=0,
                           bytes_accessed=param_bytes + io_bytes)

    vmem = pl.BlockSpec(memory_space=pltpu.MemorySpace.VMEM)
    smem = pl.BlockSpec(memory_space=pltpu.MemorySpace.SMEM)

    if B % batch_tile != 0:
        # Small-batch / inference path: one shot, everything in VMEM.
        return pl.pallas_call(
            value_kernel_small,
            out_shape=jax.ShapeDtypeStruct((B, 1), jnp.float32),
            in_specs=[vmem, vmem, vmem, vmem, smem],
            out_specs=vmem,
            cost_estimate=cost,
        )(state, w1, w2, bias_pack, bv)

    # Training-sized path: tile only the batch axis; params grid-resident.
    num_tiles = B // batch_tile
    out = pl.pallas_call(
        value_kernel_batched,
        out_shape=jax.ShapeDtypeStruct((B,), jnp.float32),
        grid=(num_tiles,),
        in_specs=[
            pl.BlockSpec((batch_tile, D), lambda i: (i, 0)),   # state tile
            pl.BlockSpec((D, H1), lambda i: (0, 0)),           # w1 (resident)
            pl.BlockSpec((H1, H2), lambda i: (0, 0)),          # w2 (resident)
            pl.BlockSpec((3, H2), lambda i: (0, 0)),           # packed biases
            smem,                                              # bv scalar
        ],
        out_specs=pl.BlockSpec((batch_tile,), lambda i: (i,)),
        compiler_params=pltpu.CompilerParams(
            dimension_semantics=("parallel",)),                # 2 TCs on v7x
        cost_estimate=cost,
    )(state, w1, w2, bias_pack, bv)
    return out.reshape(B, 1)


# ---------------------------------------------------------------------------
# Parameters / reference
# ---------------------------------------------------------------------------

def init_params(key, input_dim, h1=256, h2=256):
    """Deterministic synthetic init mirroring PyTorch nn.Linear shapes.

    PyTorch stores weights as (out, in); we store the transpose (in, out) so
    the kernel computes x @ W + b with identical math.  Matmul weights are
    bf16 (MXU-native); b1/b2/wv are packed into a single (3, h) f32 block and
    bv is a 1-D f32 scalar array for SMEM.
    """
    assert h1 == h2, "bias packing assumes equal hidden widths"
    ks = jax.random.split(key, 6)

    def uniform(k, shape, fan_in):
        bound = 1.0 / jnp.sqrt(jnp.float32(fan_in))
        return jax.random.uniform(k, shape, jnp.float32, -bound, bound)

    w1 = uniform(ks[0], (input_dim, h1), input_dim).astype(jnp.bfloat16)
    b1 = uniform(ks[1], (h1,), input_dim)
    w2 = uniform(ks[2], (h1, h2), h1).astype(jnp.bfloat16)
    b2 = uniform(ks[3], (h2,), h1)
    wv = uniform(ks[4], (h2,), h2)              # v head as a row vector
    bv = uniform(ks[5], (1,), h2)               # 1-D scalar for SMEM

    bias_pack = jnp.stack([b1, b2, wv], axis=0)  # (3, h2) single VMEM operand
    return (w1, w2, bias_pack, bv)


def value_forward_ref(state, params):
    """Pure-JAX reference mirroring the kernel math (bf16 dots, f32 accum)."""
    w1, w2, bias_pack, bv = params
    b1 = bias_pack[0:1, :]
    b2 = bias_pack[1:2, :]
    wv = bias_pack[2:3, :]
    h1 = jnp.dot(state.astype(jnp.bfloat16), w1,
                 preferred_element_type=jnp.float32)
    h1 = jnp.maximum(h1 + b1, 0.0)
    h2 = jnp.dot(h1.astype(jnp.bfloat16), w2,
                 preferred_element_type=jnp.float32)
    h2 = jnp.maximum(h2 + b2, 0.0)
    return jnp.sum(h2 * wv, axis=-1, keepdims=True) + bv[0]


# ---------------------------------------------------------------------------
# Self-test
# ---------------------------------------------------------------------------

if __name__ == "__main__":
    key = jax.random.PRNGKey(0)
    k_state, k_params, k_big = jax.random.split(key, 3)

    input_dim = 16        # input_dims = [16]
    hidden1 = 256
    hidden2 = 256
    params = init_params(k_params, input_dim, hidden1, hidden2)

    # Small-batch (inference) path.
    batch = 8
    state = jax.random.normal(k_state, (batch, input_dim), jnp.float32)
    v = jax.block_until_ready(value_forward(state, params))
    v_ref = value_forward_ref(state, params)
    assert v.shape == (batch, 1)
    assert jnp.allclose(v, v_ref, atol=1e-3, rtol=1e-3), "small-path mismatch"

    # Batched (training) path: grid over the batch, resident weights,
    # lane-dense output.
    big_batch = 1024
    state_big = jax.random.normal(k_big, (big_batch, input_dim), jnp.float32)
    v_big = jax.block_until_ready(value_forward(state_big, params))
    v_big_ref = value_forward_ref(state_big, params)
    assert v_big.shape == (big_batch, 1)
    assert jnp.allclose(v_big, v_big_ref, atol=1e-3, rtol=1e-3), \
        "batched-path mismatch"

    print("KERNEL_OK")
</pallas_src>

<mosaic_0001>
module attributes {stable_mosaic.version = 11 : i64} {
  func.func @value_kernel_small(%arg0: memref<8x16xf32, #tpu.memory_space<vmem>>, %arg1: memref<16x256xbf16, #tpu.memory_space<vmem>>, %arg2: memref<256x256xbf16, #tpu.memory_space<vmem>>, %arg3: memref<3x256xf32, #tpu.memory_space<vmem>>, %arg4: memref<1xf32, #tpu.memory_space<smem>>, %arg5: memref<8x1xf32, #tpu.memory_space<vmem>>) attributes {dimension_semantics = [], scalar_prefetch = 0 : i64, scratch_operands = 0 : i64, tpu.core_type = #tpu.core_type<tc>} {
    %c0 = arith.constant 0 : index
    %c0_0 = arith.constant 0 : index
    %0 = vector.load %arg0[%c0, %c0_0] : memref<8x16xf32, #tpu.memory_space<vmem>>, vector<8x16xf32>
    %1 = arith.truncf %0 : vector<8x16xf32> to vector<8x16xbf16>
    %c0_1 = arith.constant 0 : index
    %c0_2 = arith.constant 0 : index
    %2 = vector.load %arg1[%c0_1, %c0_2] : memref<16x256xbf16, #tpu.memory_space<vmem>>, vector<16x256xbf16>
    %cst = arith.constant dense<0.000000e+00> : vector<8x256xf32>
    %3 = tpu.matmul %1, %2, %cst {dimension_numbers = #tpu.dot_dimension_numbers<[1], [0], [0], [1], [0, 0, 1, 1], [], []>} : vector<8x16xbf16>, vector<16x256xbf16>, vector<8x256xf32> -> vector<8x256xf32>
    %c0_3 = arith.constant 0 : index
    %c0_4 = arith.constant 0 : index
    %4 = vector.load %arg3[%c0_3, %c0_4] : memref<3x256xf32, #tpu.memory_space<vmem>>, vector<1x256xf32>
    %5 = vector.broadcast %4 : vector<1x256xf32> to vector<8x256xf32>
    %6 = arith.addf %3, %5 : vector<8x256xf32>
    %cst_5 = arith.constant 0.000000e+00 : f32
    %7 = vector.broadcast %cst_5 : f32 to vector<8x256xf32>
    %8 = arith.maximumf %6, %7 : vector<8x256xf32>
    %9 = arith.truncf %8 : vector<8x256xf32> to vector<8x256xbf16>
    %c0_6 = arith.constant 0 : index
    %c0_7 = arith.constant 0 : index
    %10 = vector.load %arg2[%c0_6, %c0_7] : memref<256x256xbf16, #tpu.memory_space<vmem>>, vector<256x256xbf16>
    %cst_8 = arith.constant dense<0.000000e+00> : vector<8x256xf32>
    %11 = tpu.matmul %9, %10, %cst_8 {dimension_numbers = #tpu.dot_dimension_numbers<[1], [0], [0], [1], [0, 0, 1, 1], [], []>} : vector<8x256xbf16>, vector<256x256xbf16>, vector<8x256xf32> -> vector<8x256xf32>
    %c1 = arith.constant 1 : index
    %c0_9 = arith.constant 0 : index
    %12 = vector.load %arg3[%c1, %c0_9] : memref<3x256xf32, #tpu.memory_space<vmem>>, vector<1x256xf32>
    %13 = vector.broadcast %12 : vector<1x256xf32> to vector<8x256xf32>
    %14 = arith.addf %11, %13 : vector<8x256xf32>
    %cst_10 = arith.constant 0.000000e+00 : f32
    %15 = vector.broadcast %cst_10 : f32 to vector<8x256xf32>
    %16 = arith.maximumf %14, %15 : vector<8x256xf32>
    %c2 = arith.constant 2 : index
    %c0_11 = arith.constant 0 : index
    %17 = vector.load %arg3[%c2, %c0_11] : memref<3x256xf32, #tpu.memory_space<vmem>>, vector<1x256xf32>
    %18 = vector.broadcast %17 : vector<1x256xf32> to vector<8x256xf32>
    %19 = arith.mulf %16, %18 : vector<8x256xf32>
    %cst_12 = arith.constant dense<0.000000e+00> : vector<8xf32>
    %20 = vector.multi_reduction <add>, %19, %cst_12 [1] : vector<8x256xf32> to vector<8xf32>
    %21 = vector.shape_cast %20 : vector<8xf32> to vector<8x1xf32>
    %c0_13 = arith.constant 0 : index
    %22 = memref.load %arg4[%c0_13] : memref<1xf32, #tpu.memory_space<smem>>
    %23 = vector.broadcast %22 : f32 to vector<8x1xf32>
    %24 = arith.addf %21, %23 : vector<8x1xf32>
    %c0_14 = arith.constant 0 : index
    %c0_15 = arith.constant 0 : index
    %25 = vector.load %arg5[%c0_14, %c0_15] : memref<8x1xf32, #tpu.memory_space<vmem>>, vector<8x1xf32>
    tpu.vector_store %arg5[%c0_14, %c0_15], %24 {strides = array<i32>} : memref<8x1xf32, #tpu.memory_space<vmem>>, vector<8x1xf32>,
    return
  }
}

</mosaic_0001>

<bundles_post_ra>
// kernel: tpu_custom_call.1
= control target key start
LH: loop header
LB: loop body
LE: loop exit
PB: predicated region body
PF: predicated region fallthrough
CT: control target
= control target key end

     0   :  { %11 = vsyncpa [#allocation4], 0  ;;  %s670_s0 = inlined_call_operand.hbm [shape: f32[8,16], index: 0, kind: input, shape index: {}]   ;;  %s671_s1 = inlined_call_operand.hbm [shape: bf16[16,256], index: 1, kind: input, shape index: {}]   ;;  %s672_s2 = inlined_call_operand.hbm [shape: bf16[256,256], index: 2, kind: input, shape index: {}]   ;;  %s673_s3 = inlined_call_operand.vmem [shape: f32[3,256], index: 3, kind: input, shape index: {}]   ;;  %s674_s4 = inlined_call_operand.<no memory space> [shape: f32[1], index: 4, kind: input, shape index: {}]   ;;  %s675_s5 = inlined_call_operand.vmem [shape: f32[8,1], index: 5, kind: output, shape index: {}]  }
   0x1   :  { %12 = vsyncpa [#allocation6], 0  ;;  %s577_s18 = smov [#allocation5]   ;;  %s507_s22 = scalar_lea.hbm %s671_s1, 256 }
   0x2   :  { %s28_s19 = sshll.u32 %s577_s18, 4  ;;  %p508_p0 = scmp.ne.s32.totalorder %s671_s1, %s507_s22  ;;  %s29_s19 = int_to_ptr.vmem [resolvable:$true] %s28_s19 }
   0x3   :  { %p511_p1 = scmp.lt.u32.totalorder %s507_s22, %s671_s1 }
   0x5   :  { %p513_p2 = pnand %p511_p1, %p508_p0 }
   0x7   :  { %516 = shalt.err (!%p513_p2)
}
   0x8   :  { %s517_s27 = scalar_lea.vmem %s29_s19, 256  ;;  %p522_p4 = scmp.lt.s32.totalorder %s29_s19, %s29_s19 }
   0x9   :  { %p518_p3 = scmp.ne.s32.totalorder %s29_s19, %s517_s27  ;;  %p523_p5 = scmp.lt.s32.totalorder %s517_s27, %s517_s27 }
   0xb   :  { %p524_p6 = por %p523_p5, %p522_p4 }
   0xd   :  { %p525_p7 = pnand %p524_p6, %p518_p3 }
   0xf   :  { %528 = shalt.err (!%p525_p7)
}
  0x10   :  { %s578_s28 = smov 128   ;;  %s579_s29 = smov 8  }
  0x11   :  { %34 = dma.hbm_to_vmem [thread:$0]  %s671_s1, 256, %s29_s19, [#allocation6], %s578_s28, %s578_s28, %s579_s29  }
  0x12   :  { %s580_s7 = smov [#allocation3]   ;;  %s581_s9 = smov [#allocation7]  }
  0x13   :  { %s19_s8 = sshll.u32 %s580_s7, 4  ;;  %s40_s10 = sshll.u32 %s581_s9, 4  ;;  %s20_s8 = int_to_ptr.vmem [resolvable:$true] %s19_s8  ;;  %s41_s10 = int_to_ptr.vmem [resolvable:$true] %s40_s10 }
  0x14   :  { %s529_s13 = scalar_lea.hbm %s670_s0, 128 }
  0x15   :  { %p530_p8 = scmp.ne.s32.totalorder %s670_s0, %s529_s13  ;;  %p533_p9 = scmp.lt.u32.totalorder %s529_s13, %s670_s0 }
  0x17   :  { %p535_p10 = pnand %p533_p9, %p530_p8 }
  0x19   :  { %538 = shalt.err (!%p535_p10)
}
  0x1a   :  { %s539_s1 = scalar_lea.vmem %s20_s8, 128  ;;  %p544_p12 = scmp.lt.s32.totalorder %s20_s8, %s20_s8 }
  0x1b   :  { %p540_p11 = scmp.ne.s32.totalorder %s20_s8, %s539_s1  ;;  %p545_p13 = scmp.lt.s32.totalorder %s539_s1, %s539_s1 }
  0x1d   :  { %p546_p0 = por %p545_p13, %p544_p12 }
  0x1f   :  { %p547_p1 = pnand %p546_p0, %p540_p11 }
  0x21   :  { %550 = shalt.err (!%p547_p1)
}
  0x22   :  { %22 = dma.hbm_to_vmem [thread:$0]  %s670_s0, 128, %s20_s8, [#allocation4]  }
  0x23   :  { %s551_s22 = scalar_lea.hbm %s672_s2, 4096 }
  0x24   :  { %p552_p2 = scmp.ne.s32.totalorder %s672_s2, %s551_s22  ;;  %p555_p3 = scmp.lt.u32.totalorder %s551_s22, %s672_s2 }
  0x26   :  { %p557_p4 = pnand %p555_p3, %p552_p2 }
  0x28   :  { %560 = shalt.err (!%p557_p4)
}
  0x29   :  { %s561_s27 = scalar_lea.vmem %s41_s10, 4096  ;;  %p566_p6 = scmp.lt.s32.totalorder %s41_s10, %s41_s10 }
  0x2a   :  { %p562_p5 = scmp.ne.s32.totalorder %s41_s10, %s561_s27  ;;  %p567_p7 = scmp.lt.s32.totalorder %s561_s27, %s561_s27 }
  0x2c   :  { %p568_p8 = por %p567_p7, %p566_p6 }
  0x2e   :  { %p569_p9 = pnand %p568_p8, %p562_p5 }
  0x30   :  { %572 = shalt.err (!%p569_p9)
}
  0x31   :  { %46 = dma.hbm_to_vmem [thread:$0]  %s672_s2, 4096, %s41_s10, [#allocation6], %s578_s28, %s578_s28, %s579_s29  }
  0x32   :  { %573 = dma.done.wait [#allocation4], 128  }
  0x33   :  { %574 = vsyncadd [#allocation4], 4294967168 }
  0x34   :  { %575 = dma.done.wait [#allocation6], 4352  }
  0x35   :  { %576 = vsyncadd [#allocation6], 4294962944  ;;  %v582_v0 = vmov 0   ;;  %v456_v1 = vld [vmem:[#allocation5 + $0x4] ss:$8 sps:$4 sm:$0xff]   ;;  %v61_v3 = vld [vmem:[#allocation3] sm:$0xff]  ;;  %v67_v37 = vlaneseq }
  0x36   :  { %123 = vmatprep.mubr.bf16.mxu0 %v582_v0  ;;  %v458_v2 = vld [vmem:[#allocation5] ss:$8 sps:$4 sm:$0xff]   ;;  %91 = vmatprep.subr.bf16.mxu0 %v456_v1  ;;  %v62_v4 = vpack.c.bf16 %v61_v3, %v61_v3  ;;  %v459_v5 = vld [vmem:[#allocation7 + $0x4] ss:$8 sps:$4 sm:$0xff]   ;;  %v461_v6 = vld [vmem:[#allocation7] ss:$8 sps:$4 sm:$0xff]  }
  0x37   :  { %92 = vmatpush1.bf16.msra.mxu0 %v458_v2  ;;  %vm87_vm0 = vcmask 130048   ;;  %v462_v7 = vld [vmem:[#allocation7 + $0x14] ss:$8 sps:$4 sm:$0xff]   ;;  %341 = vmatprep.subr.bf16.mxu1 %v459_v5  ;;  %v464_v8 = vld [vmem:[#allocation7 + $0x10] ss:$8 sps:$4 sm:$0xff]   ;;  %v68_v38 = vshrl.u32 %v67_v37, 7 }
  0x38   :  { %342 = vmatpush1.bf16.msra.mxu1 %v461_v6  ;;  %v465_v9 = vld [vmem:[#allocation7 + $0x24] ss:$8 sps:$4 sm:$0xff]   ;;  %v467_v10 = vld [vmem:[#allocation7 + $0x20] ss:$8 sps:$4 sm:$0xff]   ;;  %v468_v11 = vld [vmem:[#allocation7 + $0x34] ss:$8 sps:$4 sm:$0xff]  }
  0x39   :  { %343 = vmatprep.subr.bf16.mxu1 %v462_v7  ;;  %v470_v12 = vld [vmem:[#allocation7 + $0x30] ss:$8 sps:$4 sm:$0xff]   ;;  %v471_v13 = vld [vmem:[#allocation7 + $0x44] ss:$8 sps:$4 sm:$0xff]   ;;  %v473_v14 = vld [vmem:[#allocation7 + $0x40] ss:$8 sps:$4 sm:$0xff]   ;;  %v403_v7 = vstv %s674_s4 }
  0x3a   :  { %415 = vmatmul.mubr.msk.bf16.vlgmr.msra.gmra.mrb[0].mxu0 %vm87_vm0, %v62_v4  ;;  %v474_v15 = vld [vmem:[#allocation7 + $0x54] ss:$8 sps:$4 sm:$0xff]   ;;  %v476_v16 = vld [vmem:[#allocation7 + $0x50] ss:$8 sps:$4 sm:$0xff]   ;;  %v477_v17 = vld [vmem:[#allocation7 + $0x64] ss:$8 sps:$4 sm:$0xff]  }
  0x3b   :  { %v479_v18 = vld [vmem:[#allocation7 + $0x60] ss:$8 sps:$4 sm:$0xff]   ;;  %v480_v19 = vld [vmem:[#allocation7 + $0x74] ss:$8 sps:$4 sm:$0xff]   ;;  %v482_v20 = vld [vmem:[#allocation7 + $0x70] ss:$8 sps:$4 sm:$0xff]  }
  0x3c   :  { %344 = vmatpush1.bf16.msra.mxu1 %v464_v8  ;;  %v483_v21 = vld [vmem:[#allocation7 + $0x84] ss:$8 sps:$4 sm:$0xff]   ;;  %v485_v22 = vld [vmem:[#allocation7 + $0x80] ss:$8 sps:$4 sm:$0xff]   ;;  %v486_v23 = vld [vmem:[#allocation7 + $0x94] ss:$8 sps:$4 sm:$0xff]  }
  0x3d   :  { %345 = vmatprep.subr.bf16.mxu1 %v465_v9  ;;  %v488_v24 = vld [vmem:[#allocation7 + $0x90] ss:$8 sps:$4 sm:$0xff]   ;;  %v489_v25 = vld [vmem:[#allocation7 + $0xa4] ss:$8 sps:$4 sm:$0xff]   ;;  %v491_v26 = vld [vmem:[#allocation7 + $0xa0] ss:$8 sps:$4 sm:$0xff]  }
  0x3e   :  { %v492_v27 = vld [vmem:[#allocation7 + $0xb4] ss:$8 sps:$4 sm:$0xff]   ;;  %v494_v28 = vld [vmem:[#allocation7 + $0xb0] ss:$8 sps:$4 sm:$0xff]   ;;  %v495_v29 = vld [vmem:[#allocation7 + $0xc4] ss:$8 sps:$4 sm:$0xff]  }
  0x3f   :  { %v497_v30 = vld [vmem:[#allocation7 + $0xc0] ss:$8 sps:$4 sm:$0xff]   ;;  %v498_v31 = vld [vmem:[#allocation7 + $0xd4] ss:$8 sps:$4 sm:$0xff]   ;;  %v500_v32 = vld [vmem:[#allocation7 + $0xd0] ss:$8 sps:$4 sm:$0xff]  }
  0x40   :  { %346 = vmatpush1.bf16.msra.mxu1 %v467_v10  ;;  %v501_v33 = vld [vmem:[#allocation7 + $0xe4] ss:$8 sps:$4 sm:$0xff]   ;;  %v503_v34 = vld [vmem:[#allocation7 + $0xe0] ss:$8 sps:$4 sm:$0xff]   ;;  %v504_v35 = vld [vmem:[#allocation7 + $0xf4] ss:$8 sps:$4 sm:$0xff]  }
  0x41   :  { %347 = vmatprep.subr.bf16.mxu1 %v468_v11  ;;  %v506_v36 = vld [vmem:[#allocation7 + $0xf0] ss:$8 sps:$4 sm:$0xff]   ;;  %v69_v39 = vsub.s32 0, %v68_v38  ;;  %v65_v40 = vld [vmem:[%s673_s3] ss:$4 sm:$0x3] }
  0x42   :  { %v73_v41 = vsub.s32 1, %v68_v38  ;;  %v416_v54 = vld [vmem:[%s673_s3 + $0x1] ss:$4 sm:$0x3]  ;;  %vm405_vm1 = vcmask 7168  }
  0x43   :  { %v70_v42 = vrot.slane %v65_v40, %v69_v39  ;;  %v174_v55 = vrot.slane %v416_v54, %v69_v39  ;;  %v449_v57 = vld [vmem:[%s673_s3 + $0x2] ss:$4 sm:$0x3] }
  0x44   :  { %348 = vmatpush1.bf16.msra.mxu1 %v470_v12  ;;  %v74_v43 = vrot.slane %v65_v40, %v73_v41  ;;  %v178_v56 = vrot.slane %v416_v54, %v73_v41  ;;  %v390_v61 = vrot.slane %v449_v57, %v69_v39  ;;  %v394_v0 = vrot.slane %v449_v57, %v73_v41 }
  0x45   :  { %349 = vmatprep.subr.bf16.mxu1 %v471_v13 }
  0x48   :  { %350 = vmatpush1.bf16.msra.mxu1 %v473_v14 }
  0x49   :  { %351 = vmatprep.subr.bf16.mxu1 %v474_v15 }
  0x4c   :  { %352 = vmatpush1.bf16.msra.mxu1 %v476_v16 }
  0x4d   :  { %353 = vmatprep.subr.bf16.mxu1 %v477_v17 }
  0x50   :  { %354 = vmatpush1.bf16.msra.mxu1 %v479_v18 }
  0x51   :  { %355 = vmatprep.subr.bf16.mxu1 %v480_v19 }
  0x54   :  { %356 = vmatpush1.bf16.msra.mxu1 %v482_v20 }
  0x55   :  { %357 = vmatprep.subr.bf16.mxu1 %v483_v21 }
  0x58   :  { %358 = vmatpush1.bf16.msra.mxu1 %v485_v22 }
  0x59   :  { %359 = vmatprep.subr.bf16.mxu1 %v486_v23 }
  0x5c   :  { %360 = vmatpush1.bf16.msra.mxu1 %v488_v24 }
  0x5d   :  { %361 = vmatprep.subr.bf16.mxu1 %v489_v25 }
  0x60   :  { %362 = vmatpush1.bf16.msra.mxu1 %v491_v26 }
  0x61   :  { %363 = vmatprep.subr.bf16.mxu1 %v492_v27 }
  0x64   :  { %364 = vmatpush1.bf16.msra.mxu1 %v494_v28 }
  0x65   :  { %365 = vmatprep.subr.bf16.mxu1 %v495_v29 }
  0x68   :  { %366 = vmatpush1.bf16.msra.mxu1 %v497_v30 }
  0x69   :  { %367 = vmatprep.subr.bf16.mxu1 %v498_v31 }
  0x6c   :  { %368 = vmatpush1.bf16.msra.mxu1 %v500_v32 }
  0x6d   :  { %369 = vmatprep.subr.bf16.mxu1 %v501_v33 }
  0x70   :  { %370 = vmatpush1.bf16.msra.mxu1 %v503_v34 }
  0x71   :  { %371 = vmatprep.subr.bf16.mxu1 %v504_v35 }
  0x74   :  { %372 = vmatpush1.bf16.msra.mxu1 %v506_v36 }
 0x10d   :  { %v125_v44 = vpop.f32.mrb[0].mxu0 }
 0x10e   :  { %v126_v45 = vadd.f32 %v125_v44, %v70_v42  ;;  %v127_v46 = vpop.f32.mrb[1].mxu0 }
 0x10f   :  { %v128_v47 = vadd.f32 %v127_v46, %v74_v43  ;;  %v129_v48 = vpop.f32.mrb[2].mxu0 }
 0x110   :  { %v132_v49 = vmax.f32 %v126_v45, 0.0  ;;  %v130_v50 = vpop.f32.mrb[3].mxu0 }
 0x111   :  { %v133_v51 = vmax.f32 %v128_v47, 0.0 }
 0x112   :  { %v134_v53 = vpack.c.bf16 %v132_v49, %v132_v49 }
 0x113   :  { %v135_v52 = vpack.c.bf16 %v133_v51, %v133_v51 }
 0x115   :  { %373 = vmatprep.mubr.bf16.mxu1 %v135_v52 }
 0x116   :  { %374 = vmatmul.mubr.bf16.vlgmr.msra.gmra.mrb[0].mxu1 %v134_v53 }
 0x1e9   :  { %v375_v58 = vpop.f32.mrb[0].mxu1 }
 0x1ea   :  { %v376_v59 = vadd.f32 %v375_v58, %v174_v55  ;;  %v377_v60 = vpop.f32.mrb[1].mxu1 }
 0x1eb   :  { %v378_v62 = vadd.f32 %v377_v60, %v178_v56  ;;  %v379_v63 = vpop.f32.mrb[2].mxu1 }
 0x1ec   :  { %v382_v1 = vmax.f32 %v376_v59, 0.0  ;;  %v380_v2 = vpop.f32.mrb[3].mxu1 }
 0x1ed   :  { %v383_v3 = vmax.f32 %v378_v62, 0.0 }
 0x1ee   :  { %v397_v4 = vmul.f32 %v390_v61, %v382_v1 }
 0x1ef   :  { %v398_v5 = vmul.f32 %v394_v0, %v383_v3 }
 0x1f1   :  { %v399_v6 = vadd.f32 %v398_v5, %v397_v4 }
 0x1f3   :  { %400 = vadd.xlane.f32.xlu0 %v399_v6 }
 0x280   :  { %v401_v8 = vpop.xlane.xlu0 %400 }
 0x281   :  { %v404_v9 = vadd.f32 %v403_v7, %v401_v8 }
 0x283   :  { %406 = vst.msk [vmem:[%s675_s5] sm:$0xff] %vm405_vm1, %v404_v9 }
 0x284   :  { %411 = vsyncpa [#allocation4], 1 }
 0x285   :  { %412 = vsyncpa [#allocation6], 1 }

</bundles_post_ra>
